<compile_context>
chip_gen: v5e
topology: v5e:2x2
jax: 0.10.0
libtpu: 0.0.40
codegen_flags: <defaults>
</compile_context>

<pallas_src>
import jax
import jax.numpy as jnp
from jax.experimental import pallas as pl
from jax.experimental.pallas import tpu as pltpu


HIDDEN = 32                    # hidden_size (TPU-friendly stand-in for the module's 20)
VOCAB = 64                     # output_size
BATCH = 8
LANES = 4 * HIDDEN             # gate width == packed-output width == 128
SLAB_ROWS = 136                # 96 (gates) + 32 (out proj) + 8 (bias block, 8-row padded)


def _decoder_steps_kernel(ids_ref, wslab_ref, state0_ref, out_ref, h_scr, c_scr):
    H, V = HIDDEN, VOCAB
    B = h_scr.shape[0]
    t = pl.program_id(0)

    # Load initial state into the VMEM-resident carry on the first step only.
    @pl.when(t == 0)
    def _():
        h_scr[...] = state0_ref[:, :H]
        c_scr[...] = state0_ref[:, H:]

    h = h_scr[...]
    c = c_scr[...]

    # Embedding lookup as an exact one-hot row selection, fused into the gate matmul.
    ids = ids_ref[...]                                          # (B, 1) int32
    iota = jax.lax.broadcasted_iota(jnp.int32, (B, V), 1)       # (B, V)
    onehot = (iota == ids).astype(jnp.float32)                  # (B, V)
    zh = jnp.concatenate([onehot, h], axis=-1)                  # (B, V+H) = (8, 96)

    # One MXU push.  Biases are folded into the embedding rows; i/f/o columns are
    # pre-scaled by 0.5 so gates already hold x/2 for those gates.
    gates = jnp.dot(zh, wslab_ref[0:V + H, :],
                    preferred_element_type=jnp.float32)         # (B, 4H) = (8, 128)

    # Single EUP pass over the whole vreg; sigmoid(x) == 0.5*tanh(x/2) + 0.5.
    th = jnp.tanh(gates)
    sg = 0.5 * th + 0.5
    i_g = sg[:, 0 * H:1 * H]
    f_g = sg[:, 1 * H:2 * H]
    g_g = th[:, 2 * H:3 * H]
    o_g = sg[:, 3 * H:4 * H]

    c1 = f_g * c + i_g * g_g
    h1 = o_g * jnp.tanh(c1)

    # Output projection emits the packed [pred | h1 | 0] lanes directly
    # (wout slab = [W_out^T | I_H | 0]); append c1 to complete the slab.
    out_row = (jnp.dot(h1, wslab_ref[V + H:V + 2 * H, :],
                       preferred_element_type=jnp.float32)
               + wslab_ref[V + 2 * H:V + 2 * H + 1, :])         # (B, 128)
    out_ref[...] = jnp.concatenate([out_row[:, :V + H], c1], axis=-1)

    # Carry the recurrent state to the next grid step.
    h_scr[...] = h1
    c_scr[...] = c1


def prepare_decoder_params(params):
    """One-time weight prep: fold embedding, biases, transposes and the 0.5
    sigmoid pre-scale into a single lane-dense (SLAB_ROWS, 128) f32 slab."""
    emb_tbl, w_ih, w_hh, b_ih, b_hh, w_out, b_out = params
    V, H = emb_tbl.shape
    assert 4 * H == LANES and V + 2 * H == LANES, "kernel assumes 4H == V+2H == 128"
    hp = jax.lax.Precision.HIGHEST

    # Embedding gather folded into W_ih, gate biases folded into the table rows
    # (exact for one-hot selection of a valid token id).
    emb_proj_b = jnp.dot(emb_tbl, w_ih.T, precision=hp) + (b_ih + b_hh)[None, :]  # (V, 4H)
    w_z = jnp.concatenate([emb_proj_b, w_hh.T], axis=0)                           # (V+H, 4H)

    # Pre-scale i, f, o columns by 0.5 (PyTorch gate order i, f, g, o).
    gate_scale = jnp.concatenate([
        jnp.full((2 * H,), 0.5, jnp.float32),     # i, f
        jnp.ones((H,), jnp.float32),              # g
        jnp.full((H,), 0.5, jnp.float32),         # o
    ])
    w_z = w_z * gate_scale[None, :]

    # Extended output projection: h1 @ [W_out^T | I_H | 0] = [pred | h1 | 0].
    wout_ext = jnp.concatenate(
        [w_out.T, jnp.eye(H, dtype=jnp.float32), jnp.zeros((H, H), jnp.float32)],
        axis=1)                                                                   # (H, 128)
    bout_ext = jnp.concatenate([b_out, jnp.zeros((2 * H,), jnp.float32)])[None, :]  # (1, 128)

    pad = jnp.zeros((SLAB_ROWS - (V + 2 * H) - 1, LANES), jnp.float32)
    slab = jnp.concatenate([w_z, wout_ext, bout_ext, pad], axis=0)                # (136, 128)
    return slab


def decoder_decode(token_ids, hidden, prepared):
    """Run T teacher-forced decoder steps (== T Decoder.forward calls with hidden
    threading) inside ONE gridded pallas_call.  token_ids: (T, B) int."""
    wslab = prepared
    h0, c0 = hidden
    T, B = token_ids.shape
    H, V = HIDDEN, VOCAB

    state0 = jnp.concatenate([h0[0], c0[0]], axis=-1)           # (B, 2H) = (8, 64)
    ids = token_ids.astype(jnp.int32)[..., None]                # (T, B, 1)

    packed = pl.pallas_call(
        _decoder_steps_kernel,
        out_shape=jax.ShapeDtypeStruct((T, B, LANES), jnp.float32),
        grid_spec=pltpu.PrefetchScalarGridSpec(
            num_scalar_prefetch=0,
            grid=(T,),
            in_specs=[
                # per-step token ids: tiny pipelined block
                pl.BlockSpec((None, B, 1), lambda t: (t, 0, 0)),
                # weight slab: constant index_map -> DMA'd once, VMEM resident
                pl.BlockSpec((SLAB_ROWS, LANES), lambda t: (0, 0)),
                # packed initial state: constant index_map, read only at t == 0
                pl.BlockSpec((B, 2 * H), lambda t: (0, 0)),
            ],
            out_specs=pl.BlockSpec((None, B, LANES), lambda t: (t, 0, 0)),
            scratch_shapes=[
                pltpu.VMEM((B, H), jnp.float32),   # h carry
                pltpu.VMEM((B, H), jnp.float32),   # c carry
            ],
        ),
        compiler_params=pltpu.CompilerParams(
            dimension_semantics=("arbitrary",)),   # time axis is a recurrence
    )(ids, wslab, state0)

    preds = packed[:, :, :V]                                    # (T, B, V)
    h_t = packed[-1, :, V:V + H]
    c_t = packed[-1, :, V + H:]
    return preds, (h_t[None], c_t[None])


def decoder_forward(input_seq, hidden, prepared):
    """Mirrors Decoder.forward: input_seq (B,) int, hidden = (h0, c0) each (1, B, H).
    Returns (prediction (1, B, V), (h1 (1, B, H), c1 (1, B, H)))."""
    preds, hidden_out = decoder_decode(input_seq[None, :], hidden, prepared)
    return preds, hidden_out


def _reference_forward(input_seq, hidden, params):
    """Pure-JAX reference (raw PyTorch-layout params, HIGHEST matmul precision)."""
    emb_tbl, w_ih, w_hh, b_ih, b_hh, w_out, b_out = params
    h0, c0 = hidden
    H = emb_tbl.shape[1]
    hp = jax.lax.Precision.HIGHEST
    x = emb_tbl[input_seq]
    gates = (jnp.dot(x, w_ih.T, precision=hp) + b_ih
             + jnp.dot(h0[0], w_hh.T, precision=hp) + b_hh)
    i = jax.nn.sigmoid(gates[:, 0 * H:1 * H])
    f = jax.nn.sigmoid(gates[:, 1 * H:2 * H])
    g = jnp.tanh(gates[:, 2 * H:3 * H])
    o = jax.nn.sigmoid(gates[:, 3 * H:4 * H])
    c1 = f * c0[0] + i * g
    h1 = o * jnp.tanh(c1)
    pred = jnp.dot(h1, w_out.T, precision=hp) + b_out
    return pred[None], (h1[None], c1[None])


def init_params(key, hidden_size, output_size):
    ks = jax.random.split(key, 7)
    bound = 1.0 / jnp.sqrt(hidden_size)
    emb_tbl = jax.random.normal(ks[0], (output_size, hidden_size), jnp.float32)
    w_ih = jax.random.uniform(ks[1], (4 * hidden_size, hidden_size), jnp.float32, -bound, bound)
    w_hh = jax.random.uniform(ks[2], (4 * hidden_size, hidden_size), jnp.float32, -bound, bound)
    b_ih = jax.random.uniform(ks[3], (4 * hidden_size,), jnp.float32, -bound, bound)
    b_hh = jax.random.uniform(ks[4], (4 * hidden_size,), jnp.float32, -bound, bound)
    w_out = jax.random.uniform(ks[5], (output_size, hidden_size), jnp.float32, -bound, bound)
    b_out = jax.random.uniform(ks[6], (output_size,), jnp.float32, -bound, bound)
    return emb_tbl, w_ih, w_hh, b_ih, b_hh, w_out, b_out


if __name__ == "__main__":
    key = jax.random.PRNGKey(0)
    kp, ki, kh, kc, kt = jax.random.split(key, 5)

    params = init_params(kp, HIDDEN, VOCAB)
    prepared = prepare_decoder_params(params)       # one-time weight prep (hoisted)

    input_seq = jax.random.randint(ki, (BATCH,), 0, VOCAB, dtype=jnp.int32)
    h0 = jax.random.normal(kh, (1, BATCH, HIDDEN), jnp.float32)
    c0 = jax.random.normal(kc, (1, BATCH, HIDDEN), jnp.float32)

    # Tolerances leave margin for possible reduced-precision MXU accumulation.
    ATOL_STEP, ATOL_SEQ = 2e-3, 1e-2

    # --- single step: exactly the module's forward() semantics ---
    fwd = jax.jit(decoder_forward)
    prediction, (h1, c1) = fwd(input_seq, (h0, c0), prepared)
    jax.block_until_ready((prediction, h1, c1))

    ref_pred, (ref_h1, ref_c1) = _reference_forward(input_seq, (h0, c0), params)
    assert prediction.shape == (1, BATCH, VOCAB)
    assert h1.shape == (1, BATCH, HIDDEN) and c1.shape == (1, BATCH, HIDDEN)
    assert jnp.allclose(prediction, ref_pred, atol=ATOL_STEP)
    assert jnp.allclose(h1, ref_h1, atol=ATOL_STEP)
    assert jnp.allclose(c1, ref_c1, atol=ATOL_STEP)

    # --- fused T-step decode loop: one kernel launch for the whole sequence ---
    T = 8
    token_ids = jax.random.randint(kt, (T, BATCH), 0, VOCAB, dtype=jnp.int32)
    decode = jax.jit(decoder_decode)
    preds, (hT, cT) = decode(token_ids, (h0, c0), prepared)
    jax.block_until_ready((preds, hT, cT))

    rh, rc = h0, c0
    ref_preds = []
    for t in range(T):
        p, (rh, rc) = _reference_forward(token_ids[t], (rh, rc), params)
        ref_preds.append(p[0])
    ref_preds = jnp.stack(ref_preds)
    assert preds.shape == (T, BATCH, VOCAB)
    assert jnp.allclose(preds, ref_preds, atol=ATOL_SEQ)
    assert jnp.allclose(hT, rh, atol=ATOL_SEQ)
    assert jnp.allclose(cT, rc, atol=ATOL_SEQ)

    print("KERNEL_OK")
</pallas_src>

<mosaic_0001>
module attributes {stable_mosaic.version = 11 : i64} {
  func.func @_decoder_steps_kernel(%arg0: i32, %arg1: memref<1x8x1xi32, #tpu.memory_space<vmem>>, %arg2: memref<136x128xf32, #tpu.memory_space<vmem>>, %arg3: memref<8x64xf32, #tpu.memory_space<vmem>>, %arg4: memref<1x8x128xf32, #tpu.memory_space<vmem>>, %arg5: memref<8x32xf32, #tpu.memory_space<vmem>>, %arg6: memref<8x32xf32, #tpu.memory_space<vmem>>) attributes {dimension_semantics = [#tpu.dimension_semantics<arbitrary>], iteration_bounds = array<i64: 1>, scalar_prefetch = 0 : i64, scratch_operands = 2 : i64, tpu.core_type = #tpu.core_type<tc>, window_params = [{transform_indices = @transform_0, window_bounds = array<i64: 1, 8, 1>}, {pipeline_mode = #tpu.pipeline_mode<synchronous>, transform_indices = @transform_1, window_bounds = array<i64: 136, 128>}, {pipeline_mode = #tpu.pipeline_mode<synchronous>, transform_indices = @transform_2, window_bounds = array<i64: 8, 64>}, {transform_indices = @transform_3, window_bounds = array<i64: 1, 8, 128>}]} {
    %c0_i32 = arith.constant 0 : i32
    %0 = arith.cmpi eq, %arg0, %c0_i32 : i32
    %1 = arith.extui %0 : i1 to i32
    %c0_i32_0 = arith.constant 0 : i32
    %2 = arith.cmpi ne, %1, %c0_i32_0 : i32
    scf.if %2 {
      %c0_21 = arith.constant 0 : index
      %c0_22 = arith.constant 0 : index
      %41 = vector.load %arg3[%c0_21, %c0_22] : memref<8x64xf32, #tpu.memory_space<vmem>>, vector<8x32xf32>
      %c0_23 = arith.constant 0 : index
      %c0_24 = arith.constant 0 : index
      %42 = vector.load %arg5[%c0_23, %c0_24] : memref<8x32xf32, #tpu.memory_space<vmem>>, vector<8x32xf32>
      tpu.vector_store %arg5[%c0_23, %c0_24], %41 {strides = array<i32>} : memref<8x32xf32, #tpu.memory_space<vmem>>, vector<8x32xf32>,
      %c0_25 = arith.constant 0 : index
      %c32 = arith.constant 32 : index
      %43 = vector.load %arg3[%c0_25, %c32] : memref<8x64xf32, #tpu.memory_space<vmem>>, vector<8x32xf32>
      %c0_26 = arith.constant 0 : index
      %c0_27 = arith.constant 0 : index
      %44 = vector.load %arg6[%c0_26, %c0_27] : memref<8x32xf32, #tpu.memory_space<vmem>>, vector<8x32xf32>
      tpu.vector_store %arg6[%c0_26, %c0_27], %43 {strides = array<i32>} : memref<8x32xf32, #tpu.memory_space<vmem>>, vector<8x32xf32>,
    } else {
    }
    %c0 = arith.constant 0 : index
    %c0_1 = arith.constant 0 : index
    %3 = vector.load %arg5[%c0, %c0_1] : memref<8x32xf32, #tpu.memory_space<vmem>>, vector<8x32xf32>
    %c0_2 = arith.constant 0 : index
    %c0_3 = arith.constant 0 : index
    %4 = vector.load %arg6[%c0_2, %c0_3] : memref<8x32xf32, #tpu.memory_space<vmem>>, vector<8x32xf32>
    %c0_4 = arith.constant 0 : index
    %c0_5 = arith.constant 0 : index
    %c0_6 = arith.constant 0 : index
    %5 = vector.load %arg1[%c0_4, %c0_5, %c0_6] : memref<1x8x1xi32, #tpu.memory_space<vmem>>, vector<1x8x1xi32>
    %6 = vector.shape_cast %5 : vector<1x8x1xi32> to vector<8x1xi32>
    %7 = tpu.iota {dimensions = array<i32: 1>} : vector<8x64xi32>
    %8 = vector.broadcast %6 : vector<8x1xi32> to vector<8x64xi32>
    %9 = arith.cmpi eq, %7, %8 : vector<8x64xi32>
    %10 = arith.extui %9 : vector<8x64xi1> to vector<8x64xi32>
    %11 = arith.sitofp %10 : vector<8x64xi32> to vector<8x64xf32>
    %12 = tpu.concatenate %11, %3 in 1 : vector<8x64xf32>, vector<8x32xf32> -> vector<8x96xf32>
    %c0_7 = arith.constant 0 : index
    %c0_8 = arith.constant 0 : index
    %13 = vector.load %arg2[%c0_7, %c0_8] : memref<136x128xf32, #tpu.memory_space<vmem>>, vector<96x128xf32>
    %cst = arith.constant dense<0.000000e+00> : vector<8x128xf32>
    %14 = tpu.matmul %12, %13, %cst {dimension_numbers = #tpu.dot_dimension_numbers<[1], [0], [0], [1], [0, 0, 1, 1], [], []>} : vector<8x96xf32>, vector<96x128xf32>, vector<8x128xf32> -> vector<8x128xf32>
    %15 = math.tanh %14 : vector<8x128xf32>
    %cst_9 = arith.constant 5.000000e-01 : f32
    %16 = vector.broadcast %cst_9 : f32 to vector<8x128xf32>
    %17 = arith.mulf %16, %15 : vector<8x128xf32>
    %cst_10 = arith.constant 5.000000e-01 : f32
    %18 = vector.broadcast %cst_10 : f32 to vector<8x128xf32>
    %19 = arith.addf %17, %18 : vector<8x128xf32>
    %20 = vector.extract_strided_slice %19 {offsets = [0, 0], sizes = [8, 32], strides = [1, 1]} : vector<8x128xf32> to vector<8x32xf32>
    %21 = vector.extract_strided_slice %19 {offsets = [0, 32], sizes = [8, 32], strides = [1, 1]} : vector<8x128xf32> to vector<8x32xf32>
    %22 = vector.extract_strided_slice %15 {offsets = [0, 64], sizes = [8, 32], strides = [1, 1]} : vector<8x128xf32> to vector<8x32xf32>
    %23 = vector.extract_strided_slice %19 {offsets = [0, 96], sizes = [8, 32], strides = [1, 1]} : vector<8x128xf32> to vector<8x32xf32>
    %24 = arith.mulf %21, %4 : vector<8x32xf32>
    %25 = arith.mulf %20, %22 : vector<8x32xf32>
    %26 = arith.addf %24, %25 : vector<8x32xf32>
    %27 = math.tanh %26 : vector<8x32xf32>
    %28 = arith.mulf %23, %27 : vector<8x32xf32>
    %c96 = arith.constant 96 : index
    %c0_11 = arith.constant 0 : index
    %29 = vector.load %arg2[%c96, %c0_11] : memref<136x128xf32, #tpu.memory_space<vmem>>, vector<32x128xf32>
    %cst_12 = arith.constant dense<0.000000e+00> : vector<8x128xf32>
    %30 = tpu.matmul %28, %29, %cst_12 {dimension_numbers = #tpu.dot_dimension_numbers<[1], [0], [0], [1], [0, 0, 1, 1], [], []>} : vector<8x32xf32>, vector<32x128xf32>, vector<8x128xf32> -> vector<8x128xf32>
    %c128 = arith.constant 128 : index
    %c0_13 = arith.constant 0 : index
    %31 = vector.load %arg2[%c128, %c0_13] : memref<136x128xf32, #tpu.memory_space<vmem>>, vector<1x128xf32>
    %32 = vector.broadcast %31 : vector<1x128xf32> to vector<8x128xf32>
    %33 = arith.addf %30, %32 : vector<8x128xf32>
    %34 = vector.extract_strided_slice %33 {offsets = [0, 0], sizes = [8, 96], strides = [1, 1]} : vector<8x128xf32> to vector<8x96xf32>
    %35 = tpu.concatenate %34, %26 in 1 : vector<8x96xf32>, vector<8x32xf32> -> vector<8x128xf32>
    %c0_14 = arith.constant 0 : index
    %c0_15 = arith.constant 0 : index
    %c0_16 = arith.constant 0 : index
    %36 = vector.load %arg4[%c0_14, %c0_15, %c0_16] : memref<1x8x128xf32, #tpu.memory_space<vmem>>, vector<1x8x128xf32>
    %37 = vector.shape_cast %36 : vector<1x8x128xf32> to vector<8x128xf32>
    %38 = vector.shape_cast %35 : vector<8x128xf32> to vector<1x8x128xf32>
    tpu.vector_store %arg4[%c0_14, %c0_15, %c0_16], %38 {strides = array<i32>} : memref<1x8x128xf32, #tpu.memory_space<vmem>>, vector<1x8x128xf32>,
    %c0_17 = arith.constant 0 : index
    %c0_18 = arith.constant 0 : index
    %39 = vector.load %arg5[%c0_17, %c0_18] : memref<8x32xf32, #tpu.memory_space<vmem>>, vector<8x32xf32>
    tpu.vector_store %arg5[%c0_17, %c0_18], %28 {strides = array<i32>} : memref<8x32xf32, #tpu.memory_space<vmem>>, vector<8x32xf32>,
    %c0_19 = arith.constant 0 : index
    %c0_20 = arith.constant 0 : index
    %40 = vector.load %arg6[%c0_19, %c0_20] : memref<8x32xf32, #tpu.memory_space<vmem>>, vector<8x32xf32>
    tpu.vector_store %arg6[%c0_19, %c0_20], %26 {strides = array<i32>} : memref<8x32xf32, #tpu.memory_space<vmem>>, vector<8x32xf32>,
    return
  }
  func.func @transform_0(%arg0: i32) -> (i32, i32, i32) {
    %c0_i32 = arith.constant 0 : i32
    %c0_i32_0 = arith.constant 0 : i32
    %c0_i32_1 = arith.constant 0 : i32
    return %arg0, %c0_i32, %c0_i32_0 : i32, i32, i32
  }
  func.func @transform_1(%arg0: i32) -> (i32, i32) {
    %c0_i32 = arith.constant 0 : i32
    %c0_i32_0 = arith.constant 0 : i32
    %c0_i32_1 = arith.constant 0 : i32
    return %c0_i32, %c0_i32_0 : i32, i32
  }
  func.func @transform_2(%arg0: i32) -> (i32, i32) {
    %c0_i32 = arith.constant 0 : i32
    %c0_i32_0 = arith.constant 0 : i32
    %c0_i32_1 = arith.constant 0 : i32
    return %c0_i32, %c0_i32_0 : i32, i32
  }
  func.func @transform_3(%arg0: i32) -> (i32, i32, i32) {
    %c0_i32 = arith.constant 0 : i32
    %c0_i32_0 = arith.constant 0 : i32
    %c0_i32_1 = arith.constant 0 : i32
    return %arg0, %c0_i32, %c0_i32_0 : i32, i32, i32
  }
}

</mosaic_0001>

<bundles_post_ra>
// kernel: decoder_forward.1
= control target key start
LH: loop header
LB: loop body
LE: loop exit
PB: predicated region body
PF: predicated region fallthrough
CT: control target
= control target key end

     0   :  { %8 = vsyncpa [#allocation5], 0  ;;  %s212_s15 = smov [#allocation4]   ;;  %s213_s17 = smov 128   ;;  %s268_s0 = inlined_call_operand.vmem [shape: s32[1,8,1], index: 0, kind: input, shape index: {}]   ;;  %s269_s1 = inlined_call_operand.hbm [shape: f32[136,128], index: 1, kind: input, shape index: {}]   ;;  %s270_s2 = inlined_call_operand.vmem [shape: f32[8,64], index: 2, kind: input, shape index: {}]   ;;  %s271_s3 = inlined_call_operand.vmem [shape: f32[1,8,128], index: 3, kind: output, shape index: {}]  }
   0x1   :  { %s15_s14 = sshll.u32 %s269_s1, 4  ;;  %s17_s16 = sshll.u32 %s212_s15, 4  ;;  %s16_s14 = int_to_ptr.hbm [resolvable:$true] %s15_s14  ;;  %s18_s16 = int_to_ptr.vmem [resolvable:$true] %s17_s16 }
   0x2   :  { %s214_s18 = smov 8  }
   0x3   :  { %23 = dma.hbm_to_vmem [thread:$0]  %s16_s14, 2176, %s18_s16, [#allocation5], %s213_s17, %s213_s17, %s214_s18  }
   0x4   :  { %210 = dma.done.wait [#allocation5], 2176  }
   0x5   :  { %211 = vsyncadd [#allocation5], 4294965120  ;;  %v215_v0 = vmov 0   ;;  %vm35_vm0 = vcmask 261120   ;;  %v45_v1 = vld [vmem:[%s268_s0] sm:$0xff]  ;;  %v71_v3 = vld [vmem:[#allocation4 + $0x58] sm:$0xff]  ;;  %v46_v16 = vlaneseq }
   0x6   :  { %180 = vset.pattern.permute.xlu0 %v215_v0  ;;  %v34_v2 = vld [vmem:[%s270_s2] sm:$0xff]  ;;  %s216_s1 = smov 96   ;;  %80 = vmatpush.msra.mxu0 %v71_v3  ;;  %v69_v5 = vld [vmem:[#allocation4 + $0x48] sm:$0xff]  ;;  %v68_v6 = vld [vmem:[#allocation4 + $0x40] sm:$0xff]  ;;  %s217_s0 = smov 64   ;;  %vm58_vm2 = vcmask 523264  }
   0x7   :  { %49 = vperm.xlu0 %180, %v45_v1   ;;  %36 = vst.msk [vmem:[#allocation2] sm:$0xff] %vm35_vm0, %v34_v2  ;;  %39 = vrot.lane.b32.xlu1 %v34_v2, %s216_s1  ;;  %v70_v4 = vld [vmem:[#allocation4 + $0x50] sm:$0xff]  ;;  %v67_v7 = vld [vmem:[#allocation4 + $0x38] sm:$0xff]  ;;  %v65_v10 = vld [vmem:[#allocation4 + $0x28] sm:$0xff]  ;;  %v47_v19 = vand.u32 127, %v46_v16  ;;  %vm72_vm3 = vcmask 785408  }
   0x8   :  { %81 = vmatpush.msra.mxu0 %v70_v4  ;;  %v66_v9 = vld [vmem:[#allocation4 + $0x30] sm:$0xff]  ;;  %v64_v11 = vld [vmem:[#allocation4 + $0x20] sm:$0xff]  ;;  %v63_v12 = vld [vmem:[#allocation4 + $0x18] sm:$0xff]  ;;  %v218_v20 = vmov 0.0   ;;  %s219_s2 = smov 32  }
   0x9   :  { %v62_v13 = vld [vmem:[#allocation4 + $0x10] sm:$0xff]  ;;  %v61_v14 = vld [vmem:[#allocation4 + $0x8] sm:$0xff]  ;;  %v60_v15 = vld [vmem:[#allocation4] sm:$0xff] }
   0xa   :  { %82 = vmatpush.msra.mxu0 %v69_v5  ;;  %v123_v36 = vld [vmem:[#allocation4 + $0x78] sm:$0xff]  ;;  %v122_v37 = vld [vmem:[#allocation4 + $0x70] sm:$0xff]  ;;  %v121_v38 = vld [vmem:[#allocation4 + $0x68] sm:$0xff] }
   0xb   :  { %144 = vmatpush.msra.mxu1 %v123_v36  ;;  %v120_v39 = vld [vmem:[#allocation4 + $0x60] sm:$0xff] }
   0xc   :  { %83 = vmatpush.msra.mxu0 %v68_v6  ;;  %v181_v44 = vld [vmem:[#allocation4 + $0x80] ss:$0 sm:$0xff] }
   0xd   :  { %145 = vmatpush.msra.mxu1 %v122_v37 }
   0xe   :  { %v43_v8 = vld [vmem:[#allocation2] sm:$0xff]  ;;  %84 = vmatpush.msra.mxu0 %v67_v7 }
   0xf   :  { %55 = vrot.lane.b32.xlu0 %v43_v8, %s217_s0  ;;  %146 = vmatpush.msra.mxu1 %v121_v38 }
  0x10   :  { %85 = vmatpush.msra.mxu0 %v66_v9 }
  0x11   :  { %147 = vmatpush.msra.mxu1 %v120_v39 }
  0x12   :  { %86 = vmatpush.msra.mxu0 %v65_v10 }
  0x14   :  { %87 = vmatpush.msra.mxu0 %v64_v11 }
  0x16   :  { %88 = vmatpush.msra.mxu0 %v63_v12 }
  0x18   :  { %89 = vmatpush.msra.mxu0 %v62_v13 }
  0x1a   :  { %90 = vmatpush.msra.mxu0 %v61_v14 }
  0x1c   :  { %91 = vmatpush.msra.mxu0 %v60_v15 }
  0x79   :  { %v50_v17 = vpop.permute.xlu0 %49  ;;  %v40_v18 = vpop.permute.xlu1 %39 }
  0x7a   :  { %42 = vst.msk [vmem:[#allocation3] sm:$0xff] %vm35_vm0, %v40_v18  ;;  %vm51_vm1 = vcmp.eq.s32.totalorder %v47_v19, %v50_v17 }
  0x7b   :  { %v169_v21 = vsel %vm51_vm1, 1.0, %v218_v20 }
  0x81   :  { %v56_v22 = vpop.permute.xlu0 %55  ;;  %v44_v23 = vld [vmem:[#allocation3] sm:$0xff] }
  0x82   :  { %v59_v24 = vsel %vm58_vm2, %v169_v21, %v56_v22  ;;  %100 = vrot.lane.b32.xlu2 %v44_v23, %s219_s2 }
  0x83   :  { %170 = vmatmul.msk.f32.vlgmr.msra.gmra.mxu0 %vm72_vm3, %v59_v24 }
  0xdc   :  { %v101_v31 = vpop.permute.xlu2 %100 }
 0x100   :  { %v93_v25 = vpop.f32.mrf.mxu0 }
 0x101   :  { %182 = vtanh.f32 %v93_v25 }
 0x107   :  { %v183_v26 = vpop.eup %182 }
 0x108   :  { %105 = vrot.lane.b32.xlu1 %v183_v26, %s217_s0  ;;  %v97_v27 = vmul.f32 0.5, %v183_v26 }
 0x10a   :  { %v98_v28 = vadd.f32 0.5, %v97_v27 }
 0x10c   :  { %v103_v32 = vmul.f32 %v101_v31, %v98_v28 }
 0x17a   :  { %v106_v29 = vpop.permute.xlu1 %105 }
 0x17b   :  { %v108_v30 = vmul.f32 %v106_v29, %v98_v28 }
 0x17d   :  { %110 = vrot.lane.b32.xlu2 %v108_v30, %s219_s2 }
 0x1d7   :  { %v111_v33 = vpop.permute.xlu2 %110 }
 0x1d8   :  { %v113_v34 = vadd.f32 %v111_v33, %v103_v32 }
 0x1da   :  { %184 = vtanh.f32 %v113_v34  ;;  %153 = vrot.lane.b32.xlu2 %v113_v34, %s217_s0 }
 0x1e0   :  { %v185_v35 = vpop.eup %184 }
 0x1e1   :  { %116 = vrot.lane.b32.xlu0 %v185_v35, %s217_s0 }
 0x1e9   :  { %160 = vrot.lane.b32.xlu0 %v113_v34, %s216_s1 }
 0x234   :  { %v154_v47 = vpop.permute.xlu2 %153 }
 0x253   :  { %v117_v40 = vpop.permute.xlu0 %116 }
 0x254   :  { %v119_v41 = vmul.f32 %v117_v40, %v98_v28 }
 0x256   :  { %127 = vrot.lane.b32.xlu1 %v119_v41, %s219_s2 }
 0x25b   :  { %v161_v42 = vpop.permute.xlu0 %160 }
 0x25c   :  { %163 = vst.msk [vmem:[#allocation3] sm:$0xff] %vm35_vm0, %v161_v42 }
 0x2c8   :  { %v128_v43 = vpop.permute.xlu1 %127 }
 0x2c9   :  { %159 = vst.msk [vmem:[#allocation2] sm:$0xff] %vm35_vm0, %v128_v43  ;;  %171 = vmatmul.msk.f32.vlgmr.msra.gmra.mxu1 %vm35_vm0, %v128_v43 }
 0x346   :  { %v149_v45 = vpop.f32.mrf.mxu1 }
 0x347   :  { %v150_v46 = vadd.f32 %v181_v44, %v149_v45 }
 0x349   :  { %v156_v48 = vsel %vm72_vm3, %v150_v46, %v154_v47 }
 0x34a   :  { %157 = vst [vmem:[%s271_s3] sm:$0xff] %v156_v48 }
 0x34b   :  { %168 = vsyncpa [#allocation5], 1 }

</bundles_post_ra>
